<compile_context>
chip_gen: v7x
topology: tpu7x:2x2x1
jax: 0.10.0
libtpu: 0.0.40
codegen_flags: <defaults>
</compile_context>

<pallas_src>
import functools

import jax
import jax.numpy as jnp
from jax.experimental import pallas as pl
from jax.experimental.pallas import tpu as pltpu


# ------------------------------ helpers ------------------------------------ #
def _round_up(x, m):
    return ((x + m - 1) // m) * m


def _round_down(x, m):
    return (x // m) * m


def _sublane_align(dtype):
    return {4: 8, 2: 16, 1: 32}.get(jnp.dtype(dtype).itemsize, 8)


def _vmem_budget():
    """Per-generation VMEM capacity; conservative fallback works everywhere."""
    try:
        cap = int(pltpu.get_tpu_info().vmem_capacity_bytes)
    except Exception:
        cap = 64 * 1024 * 1024          # v7x per-TC; safe on v5e/v6e too
    budget = int(cap * 0.55)            # target working-set size
    vmem_limit = int(cap * 0.85)        # scoped-VMEM limit handed to Mosaic
    return budget, vmem_limit


# ------------------------------ kernel ------------------------------------- #
def _actadd_kernel(x_ref, w_ref, b_ref, steer_ref, seq_ref, meta_ref, *scratch,
                   nk, seq_len, inv_dout):
    """One (m-tile, k-tile) grid step.

    x_ref:     (tm, tk)      activations tile (M = B*S flattened)
    w_ref:     (tk, N_pad)   weight K-slab (resident when nk == 1)
    b_ref:     (1,  N_pad)   bias (resident, constant index_map)
    steer_ref: (1,  N_pad)   c * layer_steer, f32, zero on padded columns
    seq_ref:   (tm, N_pad)   steered output tile
    meta_ref:  (tm, 1)       per-token mean of the pre-steering activation
    scratch:   optional (tm, N_pad) f32 accumulator (only when nk > 1)
    """
    mi = pl.program_id(0)
    tm = seq_ref.shape[0]

    partial_y = jnp.dot(x_ref[...], w_ref[...],
                        preferred_element_type=jnp.float32)

    def finalize(y32):
        y = y32 + b_ref[...].astype(jnp.float32)                 # (tm, N_pad)
        # Metadata (pre-steering): padded columns are exactly zero, so the
        # full-lane sum equals the sum over the true D_out columns.  Cross-lane
        # reduce runs on the XLU slot -> free while the kernel is MXU-bound.
        meta_ref[...] = (jnp.sum(y, axis=-1, keepdims=True)
                         * inv_dout).astype(meta_ref.dtype)
        # ActAdd steering fused into the single output store: rows whose global
        # index is a multiple of seq_len are sequence position 0 of a batch.
        row = mi * tm + jax.lax.broadcasted_iota(jnp.int32, (tm, 1), 0)
        is_first = (row % seq_len) == 0
        y = y + jnp.where(is_first, steer_ref[...].astype(jnp.float32), 0.0)
        seq_ref[...] = y.astype(seq_ref.dtype)

    if nk == 1:
        # K untiled: no accumulator round trip at all.
        finalize(partial_y)
    else:
        kk = pl.program_id(1)
        acc_ref = scratch[0]

        @pl.when(kk == 0)
        def _():
            acc_ref[...] = partial_y          # direct write, no zero-init pass

        @pl.when(kk != 0)
        def _():
            acc_ref[...] += partial_y

        @pl.when(kk == nk - 1)
        def _():
            finalize(acc_ref[...])


# ------------------------------ parameter prep ----------------------------- #
def prepare_actadd_params(w, b, steer, *, c=3.0):
    """One-time (parameter-load-time) preparation: padding, steer scaling and
    K-tiling decision.  Nothing here runs in the per-call hot path."""
    K, d_out = w.shape
    w_it = jnp.dtype(w.dtype).itemsize
    budget, vmem_limit = _vmem_budget()

    n_pad = _round_up(d_out, 128)

    # Keep the whole (K, N_pad) weight slab VMEM-resident when it fits
    # (double-buffer slot budgeted); otherwise stream 128-aligned K-slabs.
    if 2 * K * n_pad * w_it <= budget // 2:
        tk, k_pad = K, K
    else:
        tk = max(128, min(2048, _round_down(budget // (8 * n_pad * w_it), 128)))
        k_pad = _round_up(K, tk)
        # TODO(synk): layers so wide that even a 128-row K-slab exceeds the
        #             budget would additionally need N tiling; out of scope.

    w_p = w
    if (k_pad, n_pad) != (K, d_out):
        w_p = jnp.pad(w, ((0, k_pad - K), (0, n_pad - d_out)))
    b_p = jnp.pad(b, (0, n_pad - d_out)).reshape(1, n_pad)
    steer_p = jnp.pad(c * steer.astype(jnp.float32),
                      (0, n_pad - d_out)).reshape(1, n_pad)

    return dict(w=w_p, b=b_p, steer=steer_p, d_in=K, d_out=d_out,
                tk=tk, k_pad=k_pad, n_pad=n_pad,
                budget=budget, vmem_limit=vmem_limit)


# ------------------------------ forward ------------------------------------ #
def actadd_forward(x, params):
    """Fused base_layer (linear) + metadata + ActAdd steering.

    x: (B, S, D_in).  Returns (x_seq (B,S,D_out), x_metadata (B,S)).
    """
    B, S, D_in = x.shape
    assert D_in == params["d_in"]
    M = B * S
    out_dtype = x.dtype

    tk, k_pad, n_pad = params["tk"], params["k_pad"], params["n_pad"]
    d_out, budget = params["d_out"], params["budget"]
    w_it = jnp.dtype(params["w"].dtype).itemsize
    x_it = jnp.dtype(out_dtype).itemsize
    sub = _sublane_align(out_dtype)

    # M tile: as large as the leftover VMEM budget allows (x, out double-
    # buffered + f32 accumulator), dtype-aware sublane alignment, cap 1024.
    w_bytes = 2 * tk * n_pad * w_it
    per_row = 2 * tk * x_it + 2 * n_pad * x_it + 4 * n_pad + 8
    tm = _round_down(max(budget - w_bytes, per_row * sub) // per_row, sub)
    tm = max(sub, min(tm, 1024))
    if M <= tm:
        tm, m_pad = M, M                 # block == full M extent, no padding
    else:
        m_pad = _round_up(M, tm)

    xm = x.reshape(M, D_in)              # free: contiguous reshape
    if (m_pad, k_pad) != (M, D_in):
        # Only hit when M is ragged w.r.t. tm or K is tiled and ragged.
        xm = jnp.pad(xm, ((0, m_pad - M), (0, k_pad - D_in)))

    nk = k_pad // tk
    grid = (m_pad // tm, nk)

    kernel = functools.partial(_actadd_kernel, nk=nk, seq_len=S,
                               inv_dout=1.0 / d_out)
    scratch = [pltpu.VMEM((tm, n_pad), jnp.float32)] if nk > 1 else []

    seq_p, meta_p = pl.pallas_call(
        kernel,
        out_shape=(jax.ShapeDtypeStruct((m_pad, n_pad), out_dtype),
                   jax.ShapeDtypeStruct((m_pad, 1), jnp.float32)),
        grid_spec=pltpu.PrefetchScalarGridSpec(
            num_scalar_prefetch=0,
            grid=grid,
            in_specs=[
                pl.BlockSpec((tm, tk),    lambda mi, kk: (mi, kk)),
                pl.BlockSpec((tk, n_pad), lambda mi, kk: (kk, 0)),
                pl.BlockSpec((1, n_pad),  lambda mi, kk: (0, 0)),   # resident
                pl.BlockSpec((1, n_pad),  lambda mi, kk: (0, 0)),   # resident
            ],
            out_specs=[
                pl.BlockSpec((tm, n_pad), lambda mi, kk: (mi, 0)),
                pl.BlockSpec((tm, 1),     lambda mi, kk: (mi, 0)),
            ],
            scratch_shapes=scratch,
        ),
        compiler_params=pltpu.CompilerParams(
            dimension_semantics=("parallel", "arbitrary"),
            vmem_limit_bytes=params["vmem_limit"],
        ),
    )(xm, params["w"], params["b"], params["steer"])

    x_seq = seq_p[:M, :d_out].reshape(B, S, d_out)
    meta = meta_p[:M, 0].reshape(B, S).astype(out_dtype)
    return x_seq, meta


# ------------------------------ reference ---------------------------------- #
def _reference(x, w, b, steer, c):
    y = jnp.einsum("bsd,de->bse", x, w) + b[None, None, :]
    meta = jnp.mean(y, axis=-1)
    y = y.at[:, 0, :].add(c * steer[None, :])
    return y, meta


if __name__ == "__main__":
    # Small shapes implied by the forward: batch=2, seq=8, hidden in/out=32.
    B, S, D_IN, D_OUT = 2, 8, 32, 32
    C = 3.0

    key = jax.random.PRNGKey(0)
    kx, kw, kb, ks = jax.random.split(key, 4)
    x = jax.random.normal(kx, (B, S, D_IN), dtype=jnp.float32)
    w = jax.random.normal(kw, (D_IN, D_OUT), dtype=jnp.float32) * 0.1
    b = jax.random.normal(kb, (D_OUT,), dtype=jnp.float32) * 0.1
    layer_steer = jax.random.normal(ks, (D_OUT,), dtype=jnp.float32)

    params = prepare_actadd_params(w, b, layer_steer, c=C)   # one-time prep
    x_seq, x_meta = actadd_forward(x, params)
    jax.block_until_ready((x_seq, x_meta))

    ref_seq, ref_meta = _reference(x, w, b, layer_steer, C)
    assert x_seq.shape == ref_seq.shape and x_meta.shape == ref_meta.shape
    assert jnp.allclose(x_seq, ref_seq, atol=1e-4, rtol=1e-4)
    assert jnp.allclose(x_meta, ref_meta, atol=1e-4, rtol=1e-4)

    print("KERNEL_OK")
</pallas_src>

<mosaic_0001>
module attributes {stable_mosaic.version = 11 : i64} {
  func.func @_actadd_kernel(%arg0: i32, %arg1: i32, %arg2: memref<16x32xf32, #tpu.memory_space<vmem>>, %arg3: memref<32x128xf32, #tpu.memory_space<vmem>>, %arg4: memref<1x128xf32, #tpu.memory_space<vmem>>, %arg5: memref<1x128xf32, #tpu.memory_space<vmem>>, %arg6: memref<16x128xf32, #tpu.memory_space<vmem>>, %arg7: memref<16x1xf32, #tpu.memory_space<vmem>>) attributes {dimension_semantics = [#tpu.dimension_semantics<parallel>, #tpu.dimension_semantics<arbitrary>], iteration_bounds = array<i64: 1, 1>, scalar_prefetch = 0 : i64, scratch_operands = 0 : i64, tpu.core_type = #tpu.core_type<tc>, window_params = [{transform_indices = @transform_0, window_bounds = array<i64: 16, 32>}, {transform_indices = @transform_1, window_bounds = array<i64: 32, 128>}, {pipeline_mode = #tpu.pipeline_mode<synchronous>, transform_indices = @transform_2, window_bounds = array<i64: 1, 128>}, {pipeline_mode = #tpu.pipeline_mode<synchronous>, transform_indices = @transform_3, window_bounds = array<i64: 1, 128>}, {transform_indices = @transform_4, window_bounds = array<i64: 16, 128>}, {transform_indices = @transform_5, window_bounds = array<i64: 16, 1>}]} {
    %c0 = arith.constant 0 : index
    %c0_0 = arith.constant 0 : index
    %0 = vector.load %arg2[%c0, %c0_0] : memref<16x32xf32, #tpu.memory_space<vmem>>, vector<16x32xf32>
    %c0_1 = arith.constant 0 : index
    %c0_2 = arith.constant 0 : index
    %1 = vector.load %arg3[%c0_1, %c0_2] : memref<32x128xf32, #tpu.memory_space<vmem>>, vector<32x128xf32>
    %cst = arith.constant dense<0.000000e+00> : vector<16x128xf32>
    %2 = tpu.matmul %0, %1, %cst {dimension_numbers = #tpu.dot_dimension_numbers<[1], [0], [0], [1], [0, 0, 1, 1], [], []>} : vector<16x32xf32>, vector<32x128xf32>, vector<16x128xf32> -> vector<16x128xf32>
    %c0_3 = arith.constant 0 : index
    %c0_4 = arith.constant 0 : index
    %3 = vector.load %arg4[%c0_3, %c0_4] : memref<1x128xf32, #tpu.memory_space<vmem>>, vector<1x128xf32>
    %4 = vector.broadcast %3 : vector<1x128xf32> to vector<16x128xf32>
    %5 = arith.addf %2, %4 : vector<16x128xf32>
    %cst_5 = arith.constant dense<0.000000e+00> : vector<16xf32>
    %6 = vector.multi_reduction <add>, %5, %cst_5 [1] : vector<16x128xf32> to vector<16xf32>
    %7 = vector.shape_cast %6 : vector<16xf32> to vector<16x1xf32>
    %cst_6 = arith.constant 3.125000e-02 : f32
    %8 = vector.broadcast %cst_6 : f32 to vector<16x1xf32>
    %9 = arith.mulf %7, %8 : vector<16x1xf32>
    %c0_7 = arith.constant 0 : index
    %c0_8 = arith.constant 0 : index
    %10 = vector.load %arg7[%c0_7, %c0_8] : memref<16x1xf32, #tpu.memory_space<vmem>>, vector<16x1xf32>
    tpu.vector_store %arg7[%c0_7, %c0_8], %9 {strides = array<i32>} : memref<16x1xf32, #tpu.memory_space<vmem>>, vector<16x1xf32>,
    %c16_i32 = arith.constant 16 : i32
    %11 = arith.muli %arg0, %c16_i32 : i32
    %12 = tpu.iota {dimensions = array<i32: 0>} : vector<16x1xi32>
    %13 = vector.broadcast %11 : i32 to vector<16x1xi32>
    %14 = arith.addi %13, %12 : vector<16x1xi32>
    %c8_i32 = arith.constant 8 : i32
    %c0_i32 = arith.constant 0 : i32
    %15 = arith.cmpi eq, %c8_i32, %c0_i32 : i32
    %c1_i32 = arith.constant 1 : i32
    %16 = arith.select %15, %c1_i32, %c8_i32 : i32
    %17 = vector.broadcast %16 : i32 to vector<16x1xi32>
    %18 = arith.remsi %14, %17 : vector<16x1xi32>
    %c0_i32_9 = arith.constant 0 : i32
    %19 = vector.broadcast %c0_i32_9 : i32 to vector<16x1xi32>
    %20 = arith.cmpi ne, %18, %19 : vector<16x1xi32>
    %c0_i32_10 = arith.constant 0 : i32
    %21 = vector.broadcast %c0_i32_10 : i32 to vector<16x1xi32>
    %22 = arith.cmpi slt, %18, %21 : vector<16x1xi32>
    %c0_i32_11 = arith.constant 0 : i32
    %23 = arith.cmpi slt, %16, %c0_i32_11 : i32
    %24 = vector.broadcast %23 : i1 to vector<16x1xi1>
    %25 = vector.broadcast %24 : vector<16x1xi1> to vector<16x1xi1>
    %26 = arith.xori %22, %25 : vector<16x1xi1>
    %27 = arith.andi %26, %20 : vector<16x1xi1>
    %28 = vector.broadcast %16 : i32 to vector<16x1xi32>
    %29 = arith.addi %18, %28 : vector<16x1xi32>
    %30 = arith.select %27, %29, %18 : vector<16x1xi1>, vector<16x1xi32>
    %c0_i32_12 = arith.constant 0 : i32
    %31 = vector.broadcast %c0_i32_12 : i32 to vector<16x1xi32>
    %32 = arith.cmpi eq, %30, %31 : vector<16x1xi32>
    %c0_13 = arith.constant 0 : index
    %c0_14 = arith.constant 0 : index
    %33 = vector.load %arg5[%c0_13, %c0_14] : memref<1x128xf32, #tpu.memory_space<vmem>>, vector<1x128xf32>
    %cst_15 = arith.constant 0.000000e+00 : f32
    %34 = vector.shape_cast %32 : vector<16x1xi1> to vector<16x1xi1>
    %35 = vector.broadcast %34 : vector<16x1xi1> to vector<16x128xi1>
    %36 = vector.shape_cast %33 : vector<1x128xf32> to vector<1x128xf32>
    %37 = vector.broadcast %36 : vector<1x128xf32> to vector<16x128xf32>
    %38 = vector.broadcast %cst_15 : f32 to vector<16x128xf32>
    %39 = arith.select %35, %37, %38 : vector<16x128xi1>, vector<16x128xf32>
    %40 = arith.addf %5, %39 : vector<16x128xf32>
    %c0_16 = arith.constant 0 : index
    %c0_17 = arith.constant 0 : index
    %41 = vector.load %arg6[%c0_16, %c0_17] : memref<16x128xf32, #tpu.memory_space<vmem>>, vector<16x128xf32>
    tpu.vector_store %arg6[%c0_16, %c0_17], %40 {strides = array<i32>} : memref<16x128xf32, #tpu.memory_space<vmem>>, vector<16x128xf32>,
    return
  }
  func.func @transform_0(%arg0: i32, %arg1: i32) -> (i32, i32) {
    %c0_i32 = arith.constant 0 : i32
    return %arg0, %arg1 : i32, i32
  }
  func.func @transform_1(%arg0: i32, %arg1: i32) -> (i32, i32) {
    %c0_i32 = arith.constant 0 : i32
    %c0_i32_0 = arith.constant 0 : i32
    return %arg1, %c0_i32 : i32, i32
  }
  func.func @transform_2(%arg0: i32, %arg1: i32) -> (i32, i32) {
    %c0_i32 = arith.constant 0 : i32
    %c0_i32_0 = arith.constant 0 : i32
    %c0_i32_1 = arith.constant 0 : i32
    return %c0_i32, %c0_i32_0 : i32, i32
  }
  func.func @transform_3(%arg0: i32, %arg1: i32) -> (i32, i32) {
    %c0_i32 = arith.constant 0 : i32
    %c0_i32_0 = arith.constant 0 : i32
    %c0_i32_1 = arith.constant 0 : i32
    return %c0_i32, %c0_i32_0 : i32, i32
  }
  func.func @transform_4(%arg0: i32, %arg1: i32) -> (i32, i32) {
    %c0_i32 = arith.constant 0 : i32
    %c0_i32_0 = arith.constant 0 : i32
    return %arg0, %c0_i32 : i32, i32
  }
  func.func @transform_5(%arg0: i32, %arg1: i32) -> (i32, i32) {
    %c0_i32 = arith.constant 0 : i32
    %c0_i32_0 = arith.constant 0 : i32
    return %arg0, %c0_i32 : i32, i32
  }
}

</mosaic_0001>

<bundles_post_ra>
// kernel: tpu_custom_call.1
= control target key start
LH: loop header
LB: loop body
LE: loop exit
PB: predicated region body
PF: predicated region fallthrough
CT: control target
= control target key end

     0   :  { %11 = vsyncpa [#allocation3], 0  ;;  %s422_s0 = inlined_call_operand.hbm [shape: f32[16,32], index: 0, kind: input, shape index: {}]   ;;  %s423_s1 = inlined_call_operand.hbm [shape: f32[32,128], index: 1, kind: input, shape index: {}]   ;;  %s424_s2 = inlined_call_operand.vmem [shape: f32[1,128], index: 2, kind: input, shape index: {}]   ;;  %s425_s3 = inlined_call_operand.vmem [shape: f32[1,128], index: 3, kind: input, shape index: {}]   ;;  %s426_s4 = inlined_call_operand.hbm [shape: f32[16,128], index: 4, kind: output, shape index: {0}]   ;;  %s427_s5 = inlined_call_operand.vmem [shape: f32[16,1], index: 5, kind: output, shape index: {1}]  }
   0x1   :  { %12 = vsyncpa [#allocation6], 0 }
   0x2   :  { %13 = vsyncpa [#allocation4], 0  ;;  %s330_s18 = smov [#allocation2]   ;;  %s258_s22 = scalar_lea.hbm %s422_s0, 256 }
   0x3   :  { %s19_s19 = sshll.u32 %s330_s18, 4  ;;  %p259_p0 = scmp.ne.s32.totalorder %s422_s0, %s258_s22  ;;  %s20_s19 = int_to_ptr.vmem [resolvable:$true] %s19_s19 }
   0x4   :  { %p262_p1 = scmp.lt.u32.totalorder %s258_s22, %s422_s0 }
   0x6   :  { %p264_p2 = pnand %p262_p1, %p259_p0 }
   0x8   :  { %267 = shalt.err (!%p264_p2)
}
   0x9   :  { %s268_s27 = scalar_lea.vmem %s20_s19, 256  ;;  %p273_p4 = scmp.lt.s32.totalorder %s20_s19, %s20_s19 }
   0xa   :  { %p269_p3 = scmp.ne.s32.totalorder %s20_s19, %s268_s27  ;;  %p274_p5 = scmp.lt.s32.totalorder %s268_s27, %s268_s27 }
   0xc   :  { %p275_p6 = por %p274_p5, %p273_p4 }
   0xe   :  { %p276_p7 = pnand %p275_p6, %p269_p3 }
  0x10   :  { %279 = shalt.err (!%p276_p7)
}
  0x11   :  { %s331_s28 = smov 128   ;;  %s332_s29 = smov 8  }
  0x12   :  { %25 = dma.hbm_to_vmem [thread:$0]  %s422_s0, 256, %s20_s19, [#allocation3], %s331_s28, %s331_s28, %s332_s29  }
  0x13   :  { %s333_s7 = smov [#allocation5]   ;;  %s280_s11 = scalar_lea.hbm %s423_s1, 512 }
  0x14   :  { %s31_s8 = sshll.u32 %s333_s7, 4  ;;  %p281_p8 = scmp.ne.s32.totalorder %s423_s1, %s280_s11  ;;  %s32_s8 = int_to_ptr.vmem [resolvable:$true] %s31_s8 }
  0x15   :  { %p284_p9 = scmp.lt.u32.totalorder %s280_s11, %s423_s1 }
  0x17   :  { %p286_p10 = pnand %p284_p9, %p281_p8 }
  0x19   :  { %289 = shalt.err (!%p286_p10)
}
  0x1a   :  { %s290_s16 = scalar_lea.vmem %s32_s8, 512  ;;  %p295_p12 = scmp.lt.s32.totalorder %s32_s8, %s32_s8 }
  0x1b   :  { %p291_p11 = scmp.ne.s32.totalorder %s32_s8, %s290_s16  ;;  %p296_p13 = scmp.lt.s32.totalorder %s290_s16, %s290_s16 }
  0x1d   :  { %p297_p0 = por %p296_p13, %p295_p12 }
  0x1f   :  { %p298_p1 = pnand %p297_p0, %p291_p11 }
  0x21   :  { %301 = shalt.err (!%p298_p1)
}
  0x22   :  { %37 = dma.hbm_to_vmem [thread:$0]  %s423_s1, 512, %s32_s8, [#allocation6], %s331_s28, %s331_s28, %s332_s29  }
  0x23   :  { %324 = dma.done.wait [#allocation3], 256  }
  0x24   :  { %325 = vsyncadd [#allocation3], 4294967040 }
  0x25   :  { %326 = dma.done.wait [#allocation6], 512  }
  0x26   :  { %327 = vsyncadd [#allocation6], 4294966784  ;;  %vm61_vm0 = vcmask 261120   ;;  %v50_v0 = vld [vmem:[#allocation5] sm:$0xff]  ;;  %v51_v1 = vld [vmem:[#allocation5 + $0x8] sm:$0xff]  ;;  %v153_v8 = vlaneseq  ;;  %s334_s21 = smov [#allocation7]  }
  0x27   :  { %v52_v2 = vld [vmem:[#allocation5 + $0x10] sm:$0xff]  ;;  %v245_v3 = vpack.c.bf16 %v51_v1, %v50_v0  ;;  %v53_v4 = vld [vmem:[#allocation5 + $0x18] sm:$0xff]  ;;  %s207_s22 = sshll.u32 %s334_s21, 4  ;;  %s208_s22 = int_to_ptr.vmem [resolvable:$true] %s207_s22 }
  0x28   :  { %v48_v5 = vld [vmem:[#allocation2] sm:$0xff]  ;;  %v249_v6 = vpack.c.bf16 %v53_v4, %v52_v2  ;;  %v49_v7 = vld [vmem:[#allocation2 + $0x8] sm:$0xff]  ;;  %v154_v9 = vshrl.u32 %v153_v8, 7  ;;  %p307_p3 = scmp.lt.s32.totalorder %s208_s22, %s208_s22 }
  0x29   :  { %242 = vmatprep.mubr.msk.f32.mxu0 %vm61_vm0, %v48_v5  ;;  %246 = vmatprep.subr.bf16.mxu0 %v245_v3  ;;  %v227_v13 = vld [vmem:[%s425_s3] ss:$0 sm:$0xff]  ;;  %s302_s3 = scalar_lea.vmem %s208_s22, 256 }
  0x2a   :  { %248 = vmatpush3.bf16.msra.mxu0 %v245_v3  ;;  %v155_v10 = vadd.s32 8, %v154_v9  ;;  %v163_v12 = vand.u32 7, %v154_v9  ;;  %v224_v14 = vld [vmem:[%s424_s2] ss:$0 sm:$0xff]  ;;  %p303_p2 = scmp.ne.s32.totalorder %s208_s22, %s302_s3  ;;  %p308_p4 = scmp.lt.s32.totalorder %s302_s3, %s302_s3 }
  0x2b   :  { %250 = vmatprep.subr.bf16.mxu0 %v249_v6 }
  0x2c   :  { %v170_v11 = vand.u32 7, %v155_v10  ;;  %vm183_vm2 = vcmp.eq.s32.totalorder %v163_v12, 0  ;;  %p309_p5 = por %p308_p4, %p307_p3 }
  0x2d   :  { %v196_v19 = vsel %vm183_vm2, %v227_v13, 0.0 }
  0x2e   :  { %252 = vmatpush3.bf16.msra.mxu0 %v249_v6  ;;  %vm184_vm1 = vcmp.eq.s32.totalorder %v170_v11, 0  ;;  %p310_p6 = pnand %p309_p5, %p303_p2 }
  0x2f   :  { %v197_v16 = vsel %vm184_vm1, %v227_v13, 0.0 }
  0x31   :  { %243 = vmatmul.mubr.msk.f32.vlgmr.msra.gmra.mrb[0].mxu0 %vm61_vm0, %v49_v7 }
 0x104   :  { %v244_v15 = vpop.f32.mrb[0].mxu0 }
 0x105   :  { %v140_v17 = vadd.f32 %v244_v15, %v224_v14  ;;  %v134_v18 = vpop.f32.mrb[1].mxu0 }
 0x106   :  { %v135_v20 = vadd.f32 %v224_v14, %v134_v18 }
 0x107   :  { %v199_v21 = vadd.f32 %v197_v16, %v140_v17 }
 0x108   :  { %v198_v22 = vadd.f32 %v196_v19, %v135_v20  ;;  %143 = vadd.xlane.f32.xlu0 %v135_v20 }
 0x109   :  { %201 = vst [vmem:[#allocation7 + $0x8] sm:$0xff] %v199_v21 }
 0x10a   :  { %200 = vst [vmem:[#allocation7] sm:$0xff] %v198_v22 }
 0x10c   :  { %145 = vadd.xlane.f32.xlu0 %v140_v17 }
 0x10d   :  { %313 = shalt.err (!%p310_p6)
}
 0x10e   :  { %s314_s24 = scalar_lea.hbm %s426_s4, 256 }
 0x10f   :  { %p315_p7 = scmp.ne.s32.totalorder %s426_s4, %s314_s24  ;;  %p318_p8 = scmp.lt.u32.totalorder %s314_s24, %s426_s4 }
 0x111   :  { %p320_p9 = pnand %p318_p8, %p315_p7 }
 0x113   :  { %323 = shalt.err (!%p320_p9)
}
 0x114   :  { %213 = dma.vmem_to_hbm [thread:$0]  %s208_s22, 256, %s426_s4, [#allocation4], %s331_s28, %s331_s28, %s332_s29   ;;  %vm149_vm3 = vcmask 7168  }
 0x195   :  { %v144_v23 = vpop.xlane.xlu0 %143 }
 0x196   :  { %v147_v24 = vmul.f32 0.03125, %v144_v23 }
 0x198   :  { %150 = vst.msk [vmem:[%s427_s5] sm:$0xff] %vm149_vm3, %v147_v24 }
 0x199   :  { %v146_v25 = vpop.xlane.xlu0 %145 }
 0x19a   :  { %v148_v26 = vmul.f32 0.03125, %v146_v25 }
 0x19c   :  { %151 = vst.msk [vmem:[%s427_s5 + $0x8] sm:$0xff] %vm149_vm3, %v148_v26 }
 0x19d   :  { %328 = dma.done.wait [#allocation4], 256  }
 0x19e   :  { %329 = vsyncadd [#allocation4], 4294967040 }
 0x19f   :  { %221 = vsyncpa [#allocation3], 1 }
 0x1a0   :  { %222 = vsyncpa [#allocation6], 1 }
 0x1a1   :  { %223 = vsyncpa [#allocation4], 1 }

</bundles_post_ra>
